<compile_context>
chip_gen: v6e
topology: v6e:2x2x1
jax: 0.10.0
libtpu: 0.0.40
codegen_flags: <defaults>
</compile_context>

<pallas_src>
import math

import jax
import jax.numpy as jnp
from jax.experimental import pallas as pl
from jax.experimental.pallas import tpu as pltpu

d_k = d_v = 64
d_model = 512
n_heads = 8
LN_EPS = 1e-5
MASK_FILL = -1000000000.0


def _mha_encoder_kernel(q_in_ref, k_in_ref, v_in_ref, mask_ref, bias_ref,
                        wq_ref, wk_ref, wv_ref, wfc_ref,
                        out_ref, attn_ref, acc_ref):
    """Grid step = (batch tile, head). Accumulates the output projection across heads in
    acc_ref and finalizes residual + LayerNorm on the last head."""
    h = pl.program_id(1)
    Bt, S, _ = q_in_ref.shape

    @pl.when(h == 0)
    def _init():
        acc_ref[...] = jnp.zeros_like(acc_ref)

    x_q = q_in_ref[...]                                    # (Bt, S, d_model) f32 (residual / LN)
    xq_bf = x_q.reshape(Bt * S, d_model).astype(jnp.bfloat16)
    xk_bf = k_in_ref[...].reshape(Bt * S, d_model)         # already bf16 (host cast)
    xv_bf = v_in_ref[...].reshape(Bt * S, d_model)

    # Per-head projections: K=512 contraction on the MXU, f32 accumulation.
    # The 1/sqrt(d_k) softmax scale is folded into wq_ref on the host.
    q_h = jnp.dot(xq_bf, wq_ref[0], preferred_element_type=jnp.float32)    # (Bt*S, d_k)
    k_h = jnp.dot(xk_bf, wk_ref[0], preferred_element_type=jnp.float32)    # (Bt*S, d_k)
    v_h = jnp.dot(xv_bf, wv_ref[0], preferred_element_type=jnp.float32)    # (Bt*S, d_v)

    # Cast BEFORE the relayout back to (Bt, S, d): halves relayout bytes / vreg pressure.
    q3 = q_h.astype(jnp.bfloat16).reshape(Bt, S, d_k)
    k3 = k_h.astype(jnp.bfloat16).reshape(Bt, S, d_k)
    v3 = v_h.astype(jnp.bfloat16).reshape(Bt, S, d_v)

    # Scores for this head: (Bt, S, S) f32 (scale already folded into W_Q).
    scores = jnp.einsum('bqd,bkd->bqk', q3, k3, preferred_element_type=jnp.float32)
    scores = scores + bias_ref[...].reshape(Bt, S, S).astype(jnp.float32)   # bf16 bias, f32 add
    scores = jnp.where(mask_ref[...] != 0, MASK_FILL, scores)

    # Softmax over keys (f32 math); normalization via EUP reciprocal (approx: rows sum to
    # 1 only to ~1e-3 relative, below the bf16 storage precision anyway).
    m = jnp.max(scores, axis=-1, keepdims=True)
    e = jnp.exp(scores - m)
    denom = jnp.sum(e, axis=-1, keepdims=True)
    attn_bf = (e * pl.reciprocal(denom, approx=True)).astype(jnp.bfloat16)  # (Bt, S, S)

    # Single bf16 store; the same tensor feeds the context matmul, so the stored attention
    # weights are exactly the ones used to produce the output.
    # TODO(synk): for S not a multiple of 128, present a lane-dense flattened (Bt, S*S)
    # attn slab (reshaped in the wrapper) to avoid masked vst partial stores.
    attn_ref[...] = attn_bf.reshape(Bt, 1, S, S)

    # Context for this head and its contribution to the output projection.
    ctx = jnp.einsum('bqk,bkd->bqd', attn_bf, v3, preferred_element_type=jnp.float32)
    ctx_bf = ctx.astype(jnp.bfloat16).reshape(Bt * S, d_v)
    acc_ref[...] += jnp.dot(ctx_bf, wfc_ref[0], preferred_element_type=jnp.float32)

    @pl.when(h == n_heads - 1)
    def _finalize():
        y = acc_ref[...].reshape(Bt, S, d_model) + x_q
        mean = jnp.mean(y, axis=-1, keepdims=True)
        var = jnp.mean((y - mean) ** 2, axis=-1, keepdims=True)
        # Fresh nn.LayerNorm(d_model) in the module forward => weight=1, bias=0, eps=1e-5.
        out_ref[...] = (y - mean) * jax.lax.rsqrt(var + LN_EPS)


def _pick_batch_tile(B, S):
    """Fold enough batch elements per grid step that Bt*S gives the MXU a decent M and the
    per-step overhead is amortized, while keeping the (Bt, S, S) blocks small."""
    target = max(1, 256 // max(S, 1))
    for cand in range(min(B, target), 0, -1):
        if B % cand == 0:
            return cand
    return 1


def _vmem_limit_bytes(Bt, S):
    """Scoped-VMEM limit sized from the actual (double-buffered) block footprint."""
    blk_in = (Bt * S * d_model * 4            # input_Q f32
              + 2 * Bt * S * d_model * 2      # input_K / input_V bf16
              + Bt * S * S * 1                # mask int8
              + Bt * S * S * 2                # bias bf16
              + 3 * d_model * d_k * 2         # W_Q / W_K / W_V per-head blocks bf16
              + d_v * d_model * 2)            # fc per-head block bf16
    blk_out = Bt * S * d_model * 4 + Bt * S * S * 2
    scratch = Bt * S * d_model * 4
    temps = 4 * Bt * S * S * 4 + 4 * Bt * S * d_model * 4
    est = 2 * (blk_in + blk_out) + scratch + temps
    return int(min(128 << 20, max(32 << 20, 2 * est)))


@jax.jit
def multi_head_attention_encoder(input_Q, input_K, input_V, attn_mask, MD_bias,
                                 Wq_t, Wk_t, Wv_t, Wfc_t):
    """input_*: (B, S, d_model) f32; attn_mask: (B, S, S) bool (True == masked out);
    MD_bias: (B, H, S, S) f32.  W*_t are the nn.Linear weights transposed to (in, out)."""
    B, S, _ = input_Q.shape
    Bt = _pick_batch_tile(B, S)
    nB = B // Bt

    # Host-side prep: fold the softmax scale into W_Q, split weights per head, cast the
    # matmul-only operands (weights, bias, K, V) to bf16, mask to int8.
    inv_sqrt_dk = 1.0 / math.sqrt(d_k)
    wq = (Wq_t * inv_sqrt_dk).reshape(d_model, n_heads, d_k).transpose(1, 0, 2).astype(jnp.bfloat16)
    wk = Wk_t.reshape(d_model, n_heads, d_k).transpose(1, 0, 2).astype(jnp.bfloat16)
    wv = Wv_t.reshape(d_model, n_heads, d_v).transpose(1, 0, 2).astype(jnp.bfloat16)
    wfc = Wfc_t.reshape(n_heads, d_v, d_model).astype(jnp.bfloat16)
    xk_bf = input_K.astype(jnp.bfloat16)
    xv_bf = input_V.astype(jnp.bfloat16)
    bias_bf = MD_bias.astype(jnp.bfloat16)
    mask_i8 = attn_mask.astype(jnp.int8)

    slab = lambda b, h: (b, 0, 0)
    per_head4 = lambda b, h: (b, h, 0, 0)
    w_head = lambda b, h: (h, 0, 0)

    out_shapes = (
        jax.ShapeDtypeStruct((B, S, d_model), jnp.float32),       # LayerNorm output
        jax.ShapeDtypeStruct((B, n_heads, S, S), jnp.bfloat16),   # attention weights (bf16 writeback)
    )

    out, attn_bf16 = pl.pallas_call(
        _mha_encoder_kernel,
        out_shape=out_shapes,
        grid=(nB, n_heads),
        in_specs=[
            pl.BlockSpec((Bt, S, d_model), slab),          # input_Q (f32, residual)
            pl.BlockSpec((Bt, S, d_model), slab),          # input_K (bf16)
            pl.BlockSpec((Bt, S, d_model), slab),          # input_V (bf16)
            pl.BlockSpec((Bt, S, S), slab),                # attn_mask (int8)
            pl.BlockSpec((Bt, 1, S, S), per_head4),        # MD_bias (bf16), head h
            pl.BlockSpec((1, d_model, d_k), w_head),       # W_Q^T column block of head h (scaled)
            pl.BlockSpec((1, d_model, d_k), w_head),       # W_K^T column block
            pl.BlockSpec((1, d_model, d_v), w_head),       # W_V^T column block
            pl.BlockSpec((1, d_v, d_model), w_head),       # fc^T row block
        ],
        out_specs=(
            pl.BlockSpec((Bt, S, d_model), slab),          # revisited across heads -> final write only
            pl.BlockSpec((Bt, 1, S, S), per_head4),
        ),
        scratch_shapes=[pltpu.VMEM((Bt * S, d_model), jnp.float32)],   # output-projection accumulator
        compiler_params=pltpu.CompilerParams(
            dimension_semantics=("parallel", "arbitrary"),
            vmem_limit_bytes=_vmem_limit_bytes(Bt, S)),
    )(input_Q, xk_bf, xv_bf, mask_i8, bias_bf, wq, wk, wv, wfc)

    # Module semantics return f32 attention weights; the kernel writes bf16 to halve the
    # dominant HBM writeback, upcast here (layout plumbing, not extra compute).
    return out, attn_bf16.astype(jnp.float32)


def _reference(input_Q, input_K, input_V, attn_mask, MD_bias, Wq_t, Wk_t, Wv_t, Wfc_t):
    """Pure-f32 reference matching the PyTorch module semantics."""
    B, S, _ = input_Q.shape
    Q = (input_Q @ Wq_t).reshape(B, S, n_heads, d_k).transpose(0, 2, 1, 3)
    K = (input_K @ Wk_t).reshape(B, S, n_heads, d_k).transpose(0, 2, 1, 3)
    V = (input_V @ Wv_t).reshape(B, S, n_heads, d_v).transpose(0, 2, 1, 3)
    scores = jnp.einsum('bhqd,bhkd->bhqk', Q, K) / math.sqrt(d_k) + MD_bias
    scores = jnp.where(attn_mask[:, None, :, :], MASK_FILL, scores)
    attn = jax.nn.softmax(scores, axis=-1)
    ctx = jnp.einsum('bhqk,bhkd->bhqd', attn, V).transpose(0, 2, 1, 3).reshape(B, S, n_heads * d_v)
    out = ctx @ Wfc_t + input_Q
    mean = jnp.mean(out, axis=-1, keepdims=True)
    var = jnp.mean((out - mean) ** 2, axis=-1, keepdims=True)
    return (out - mean) / jnp.sqrt(var + LN_EPS), attn


if __name__ == "__main__":
    B, S = 2, 8
    key = jax.random.PRNGKey(0)
    ks = jax.random.split(key, 7)

    input_Q = jax.random.normal(ks[0], (B, S, d_model), jnp.float32)
    input_K = input_Q   # encoder self-attention: same source
    input_V = input_Q
    attn_mask = jax.random.bernoulli(ks[1], 0.2, (B, S, S))            # True == masked out
    MD_bias = 0.1 * jax.random.normal(ks[2], (B, n_heads, S, S), jnp.float32)

    # Deterministic "Linear" weights stored transposed to (in, out), bias=False.
    w_scale = 1.0 / math.sqrt(d_model)
    Wq_t = w_scale * jax.random.normal(ks[3], (d_model, n_heads * d_k), jnp.float32)
    Wk_t = w_scale * jax.random.normal(ks[4], (d_model, n_heads * d_k), jnp.float32)
    Wv_t = w_scale * jax.random.normal(ks[5], (d_model, n_heads * d_v), jnp.float32)
    Wfc_t = w_scale * jax.random.normal(ks[6], (n_heads * d_v, d_model), jnp.float32)

    out, attn = multi_head_attention_encoder(
        input_Q, input_K, input_V, attn_mask, MD_bias, Wq_t, Wk_t, Wv_t, Wfc_t)
    jax.block_until_ready((out, attn))

    ref_out, ref_attn = _reference(
        input_Q, input_K, input_V, attn_mask, MD_bias, Wq_t, Wk_t, Wv_t, Wfc_t)
    assert out.shape == (B, S, d_model) and attn.shape == (B, n_heads, S, S)
    # Tolerances loosened vs. a pure-f32 reference: matmuls run in bf16 (f32 accumulate),
    # bias/K/V shipped bf16, attention weights stored bf16.
    assert jnp.allclose(out, ref_out, atol=5e-2, rtol=5e-2)
    assert jnp.allclose(attn, ref_attn, atol=2e-2, rtol=2e-2)

    print("KERNEL_OK")
</pallas_src>

<mosaic_0001>
module attributes {stable_mosaic.version = 11 : i64} {
  func.func @_mha_encoder_kernel(%arg0: i32, %arg1: i32, %arg2: memref<2x8x512xf32, #tpu.memory_space<vmem>>, %arg3: memref<2x8x512xbf16, #tpu.memory_space<vmem>>, %arg4: memref<2x8x512xbf16, #tpu.memory_space<vmem>>, %arg5: memref<2x8x8xi8, #tpu.memory_space<vmem>>, %arg6: memref<2x1x8x8xbf16, #tpu.memory_space<vmem>>, %arg7: memref<1x512x64xbf16, #tpu.memory_space<vmem>>, %arg8: memref<1x512x64xbf16, #tpu.memory_space<vmem>>, %arg9: memref<1x512x64xbf16, #tpu.memory_space<vmem>>, %arg10: memref<1x64x512xbf16, #tpu.memory_space<vmem>>, %arg11: memref<2x8x512xf32, #tpu.memory_space<vmem>>, %arg12: memref<2x1x8x8xbf16, #tpu.memory_space<vmem>>, %arg13: memref<16x512xf32, #tpu.memory_space<vmem>>) attributes {dimension_semantics = [#tpu.dimension_semantics<parallel>, #tpu.dimension_semantics<arbitrary>], iteration_bounds = array<i64: 1, 8>, scalar_prefetch = 0 : i64, scratch_operands = 1 : i64, tpu.core_type = #tpu.core_type<tc>, window_params = [{transform_indices = @transform_0, window_bounds = array<i64: 2, 8, 512>}, {transform_indices = @transform_1, window_bounds = array<i64: 2, 8, 512>}, {transform_indices = @transform_2, window_bounds = array<i64: 2, 8, 512>}, {transform_indices = @transform_3, window_bounds = array<i64: 2, 8, 8>}, {transform_indices = @transform_4, window_bounds = array<i64: 2, 1, 8, 8>}, {transform_indices = @transform_5, window_bounds = array<i64: 1, 512, 64>}, {transform_indices = @transform_6, window_bounds = array<i64: 1, 512, 64>}, {transform_indices = @transform_7, window_bounds = array<i64: 1, 512, 64>}, {transform_indices = @transform_8, window_bounds = array<i64: 1, 64, 512>}, {transform_indices = @transform_9, window_bounds = array<i64: 2, 8, 512>}, {transform_indices = @transform_10, window_bounds = array<i64: 2, 1, 8, 8>}]} {
    %c0_i32 = arith.constant 0 : i32
    %0 = arith.cmpi eq, %arg1, %c0_i32 : i32
    %1 = arith.extui %0 : i1 to i32
    %c0_i32_0 = arith.constant 0 : i32
    %2 = arith.cmpi ne, %1, %c0_i32_0 : i32
    scf.if %2 {
      %cst_45 = arith.constant 0.000000e+00 : f32
      %60 = vector.broadcast %cst_45 : f32 to vector<16x512xf32>
      %c0_46 = arith.constant 0 : index
      %c0_47 = arith.constant 0 : index
      %61 = vector.load %arg13[%c0_46, %c0_47] : memref<16x512xf32, #tpu.memory_space<vmem>>, vector<16x512xf32>
      tpu.vector_store %arg13[%c0_46, %c0_47], %60 {strides = array<i32>} : memref<16x512xf32, #tpu.memory_space<vmem>>, vector<16x512xf32>,
    } else {
    }
    %c0 = arith.constant 0 : index
    %c0_1 = arith.constant 0 : index
    %c0_2 = arith.constant 0 : index
    %3 = vector.load %arg2[%c0, %c0_1, %c0_2] : memref<2x8x512xf32, #tpu.memory_space<vmem>>, vector<2x8x512xf32>
    %4 = vector.shape_cast %3 : vector<2x8x512xf32> to vector<16x512xf32>
    %5 = arith.truncf %4 : vector<16x512xf32> to vector<16x512xbf16>
    %c0_3 = arith.constant 0 : index
    %c0_4 = arith.constant 0 : index
    %c0_5 = arith.constant 0 : index
    %6 = vector.load %arg3[%c0_3, %c0_4, %c0_5] : memref<2x8x512xbf16, #tpu.memory_space<vmem>>, vector<2x8x512xbf16>
    %7 = vector.shape_cast %6 : vector<2x8x512xbf16> to vector<16x512xbf16>
    %c0_6 = arith.constant 0 : index
    %c0_7 = arith.constant 0 : index
    %c0_8 = arith.constant 0 : index
    %8 = vector.load %arg4[%c0_6, %c0_7, %c0_8] : memref<2x8x512xbf16, #tpu.memory_space<vmem>>, vector<2x8x512xbf16>
    %9 = vector.shape_cast %8 : vector<2x8x512xbf16> to vector<16x512xbf16>
    %c0_9 = arith.constant 0 : index
    %c0_10 = arith.constant 0 : index
    %c0_11 = arith.constant 0 : index
    %10 = vector.load %arg7[%c0_9, %c0_10, %c0_11] : memref<1x512x64xbf16, #tpu.memory_space<vmem>>, vector<1x512x64xbf16>
    %11 = vector.shape_cast %10 : vector<1x512x64xbf16> to vector<512x64xbf16>
    %cst = arith.constant dense<0.000000e+00> : vector<16x64xf32>
    %12 = tpu.matmul %5, %11, %cst {dimension_numbers = #tpu.dot_dimension_numbers<[1], [0], [0], [1], [0, 0, 1, 1], [], []>} : vector<16x512xbf16>, vector<512x64xbf16>, vector<16x64xf32> -> vector<16x64xf32>
    %c0_12 = arith.constant 0 : index
    %c0_13 = arith.constant 0 : index
    %c0_14 = arith.constant 0 : index
    %13 = vector.load %arg8[%c0_12, %c0_13, %c0_14] : memref<1x512x64xbf16, #tpu.memory_space<vmem>>, vector<1x512x64xbf16>
    %14 = vector.shape_cast %13 : vector<1x512x64xbf16> to vector<512x64xbf16>
    %cst_15 = arith.constant dense<0.000000e+00> : vector<16x64xf32>
    %15 = tpu.matmul %7, %14, %cst_15 {dimension_numbers = #tpu.dot_dimension_numbers<[1], [0], [0], [1], [0, 0, 1, 1], [], []>} : vector<16x512xbf16>, vector<512x64xbf16>, vector<16x64xf32> -> vector<16x64xf32>
    %c0_16 = arith.constant 0 : index
    %c0_17 = arith.constant 0 : index
    %c0_18 = arith.constant 0 : index
    %16 = vector.load %arg9[%c0_16, %c0_17, %c0_18] : memref<1x512x64xbf16, #tpu.memory_space<vmem>>, vector<1x512x64xbf16>
    %17 = vector.shape_cast %16 : vector<1x512x64xbf16> to vector<512x64xbf16>
    %cst_19 = arith.constant dense<0.000000e+00> : vector<16x64xf32>
    %18 = tpu.matmul %9, %17, %cst_19 {dimension_numbers = #tpu.dot_dimension_numbers<[1], [0], [0], [1], [0, 0, 1, 1], [], []>} : vector<16x512xbf16>, vector<512x64xbf16>, vector<16x64xf32> -> vector<16x64xf32>
    %19 = arith.truncf %12 : vector<16x64xf32> to vector<16x64xbf16>
    %20 = vector.shape_cast %19 : vector<16x64xbf16> to vector<2x8x64xbf16>
    %21 = arith.truncf %15 : vector<16x64xf32> to vector<16x64xbf16>
    %22 = vector.shape_cast %21 : vector<16x64xbf16> to vector<2x8x64xbf16>
    %23 = arith.truncf %18 : vector<16x64xf32> to vector<16x64xbf16>
    %24 = vector.shape_cast %23 : vector<16x64xbf16> to vector<2x8x64xbf16>
    "tpu.trace_start"() <{level = 10 : i32, message = "bqd,bkd->bqk"}> : () -> ()
    %cst_20 = arith.constant dense<0.000000e+00> : vector<2x8x8xf32>
    %25 = tpu.matmul %20, %22, %cst_20 {dimension_numbers = #tpu.dot_dimension_numbers<[2], [2], [1], [1], [0, 0, 0, 1, 1, 1], [0], [0]>} : vector<2x8x64xbf16>, vector<2x8x64xbf16>, vector<2x8x8xf32> -> vector<2x8x8xf32>
    "tpu.trace_stop"() : () -> ()
    %c0_21 = arith.constant 0 : index
    %c0_22 = arith.constant 0 : index
    %c0_23 = arith.constant 0 : index
    %c0_24 = arith.constant 0 : index
    %26 = vector.load %arg6[%c0_21, %c0_22, %c0_23, %c0_24] : memref<2x1x8x8xbf16, #tpu.memory_space<vmem>>, vector<2x1x8x8xbf16>
    %27 = vector.shape_cast %26 : vector<2x1x8x8xbf16> to vector<2x8x8xbf16>
    %28 = arith.extf %27 : vector<2x8x8xbf16> to vector<2x8x8xf32>
    %29 = arith.addf %25, %28 : vector<2x8x8xf32>
    %c0_25 = arith.constant 0 : index
    %c0_26 = arith.constant 0 : index
    %c0_27 = arith.constant 0 : index
    %30 = vector.load %arg5[%c0_25, %c0_26, %c0_27] : memref<2x8x8xi8, #tpu.memory_space<vmem>>, vector<2x8x8xi8>
    %c0_i8 = arith.constant 0 : i8
    %31 = vector.broadcast %c0_i8 : i8 to vector<2x8x8xi8>
    %32 = arith.cmpi ne, %30, %31 : vector<2x8x8xi8>
    %cst_28 = arith.constant -1.000000e+09 : f32
    %33 = vector.broadcast %cst_28 : f32 to vector<2x8x8xf32>
    %34 = arith.select %32, %33, %29 : vector<2x8x8xi1>, vector<2x8x8xf32>
    %cst_29 = arith.constant dense<0xFF800000> : vector<2x8xf32>
    %35 = vector.multi_reduction <maximumf>, %34, %cst_29 [2] : vector<2x8x8xf32> to vector<2x8xf32>
    %36 = vector.shape_cast %35 : vector<2x8xf32> to vector<2x8x1xf32>
    %37 = vector.broadcast %36 : vector<2x8x1xf32> to vector<2x8x8xf32>
    %38 = arith.subf %34, %37 : vector<2x8x8xf32>
    %39 = math.exp %38 : vector<2x8x8xf32>
    %cst_30 = arith.constant dense<0.000000e+00> : vector<2x8xf32>
    %40 = vector.multi_reduction <add>, %39, %cst_30 [2] : vector<2x8x8xf32> to vector<2x8xf32>
    %41 = vector.shape_cast %40 : vector<2x8xf32> to vector<2x8x1xf32>
    %42 = tpu.reciprocal %41 {approx = true} : vector<2x8x1xf32> -> vector<2x8x1xf32>
    %43 = vector.broadcast %42 : vector<2x8x1xf32> to vector<2x8x8xf32>
    %44 = arith.mulf %39, %43 : vector<2x8x8xf32>
    %45 = arith.truncf %44 : vector<2x8x8xf32> to vector<2x8x8xbf16>
    %46 = vector.shape_cast %45 : vector<2x8x8xbf16> to vector<2x1x8x8xbf16>
    %c0_31 = arith.constant 0 : index
    %c0_32 = arith.constant 0 : index
    %c0_33 = arith.constant 0 : index
    %c0_34 = arith.constant 0 : index
    %47 = vector.load %arg12[%c0_31, %c0_32, %c0_33, %c0_34] : memref<2x1x8x8xbf16, #tpu.memory_space<vmem>>, vector<2x1x8x8xbf16>
    tpu.vector_store %arg12[%c0_31, %c0_32, %c0_33, %c0_34], %46 {strides = array<i32>} : memref<2x1x8x8xbf16, #tpu.memory_space<vmem>>, vector<2x1x8x8xbf16>,
    "tpu.trace_start"() <{level = 10 : i32, message = "bqk,bkd->bqd"}> : () -> ()
    %cst_35 = arith.constant dense<0.000000e+00> : vector<2x8x64xf32>
    %48 = tpu.matmul %45, %24, %cst_35 {dimension_numbers = #tpu.dot_dimension_numbers<[2], [1], [1], [2], [0, 0, 0, 1, 1, 2], [0], [0]>} : vector<2x8x8xbf16>, vector<2x8x64xbf16>, vector<2x8x64xf32> -> vector<2x8x64xf32>
    "tpu.trace_stop"() : () -> ()
    %49 = arith.truncf %48 : vector<2x8x64xf32> to vector<2x8x64xbf16>
    %50 = vector.shape_cast %49 : vector<2x8x64xbf16> to vector<16x64xbf16>
    %c0_36 = arith.constant 0 : index
    %c0_37 = arith.constant 0 : index
    %51 = vector.load %arg13[%c0_36, %c0_37] : memref<16x512xf32, #tpu.memory_space<vmem>>, vector<16x512xf32>
    %c0_38 = arith.constant 0 : index
    %c0_39 = arith.constant 0 : index
    %c0_40 = arith.constant 0 : index
    %52 = vector.load %arg10[%c0_38, %c0_39, %c0_40] : memref<1x64x512xbf16, #tpu.memory_space<vmem>>, vector<1x64x512xbf16>
    %53 = vector.shape_cast %52 : vector<1x64x512xbf16> to vector<64x512xbf16>
    %cst_41 = arith.constant dense<0.000000e+00> : vector<16x512xf32>
    %54 = tpu.matmul %50, %53, %cst_41 {dimension_numbers = #tpu.dot_dimension_numbers<[1], [0], [0], [1], [0, 0, 1, 1], [], []>} : vector<16x64xbf16>, vector<64x512xbf16>, vector<16x512xf32> -> vector<16x512xf32>
    %55 = arith.addf %51, %54 : vector<16x512xf32>
    %c0_42 = arith.constant 0 : index
    %c0_43 = arith.constant 0 : index
    %56 = vector.load %arg13[%c0_42, %c0_43] : memref<16x512xf32, #tpu.memory_space<vmem>>, vector<16x512xf32>
    tpu.vector_store %arg13[%c0_42, %c0_43], %55 {strides = array<i32>} : memref<16x512xf32, #tpu.memory_space<vmem>>, vector<16x512xf32>,
    %c7_i32 = arith.constant 7 : i32
    %57 = arith.cmpi eq, %arg1, %c7_i32 : i32
    %58 = arith.extui %57 : i1 to i32
    %c0_i32_44 = arith.constant 0 : i32
    %59 = arith.cmpi ne, %58, %c0_i32_44 : i32
    scf.if %59 {
      %c0_45 = arith.constant 0 : index
      %c0_46 = arith.constant 0 : index
      %60 = vector.load %arg13[%c0_45, %c0_46] : memref<16x512xf32, #tpu.memory_space<vmem>>, vector<16x512xf32>
      %61 = vector.shape_cast %60 : vector<16x512xf32> to vector<2x8x512xf32>
      %62 = arith.addf %61, %3 : vector<2x8x512xf32>
      %cst_47 = arith.constant dense<0.000000e+00> : vector<2x8xf32>
      %63 = vector.multi_reduction <add>, %62, %cst_47 [2] : vector<2x8x512xf32> to vector<2x8xf32>
      %64 = vector.shape_cast %63 : vector<2x8xf32> to vector<2x8x1xf32>
      %cst_48 = arith.constant 5.120000e+02 : f32
      %65 = vector.broadcast %cst_48 : f32 to vector<2x8x1xf32>
      %66 = arith.divf %64, %65 : vector<2x8x1xf32>
      %67 = vector.broadcast %66 : vector<2x8x1xf32> to vector<2x8x512xf32>
      %68 = arith.subf %62, %67 : vector<2x8x512xf32>
      %69 = arith.mulf %68, %68 : vector<2x8x512xf32>
      %cst_49 = arith.constant dense<0.000000e+00> : vector<2x8xf32>
      %70 = vector.multi_reduction <add>, %69, %cst_49 [2] : vector<2x8x512xf32> to vector<2x8xf32>
      %71 = vector.shape_cast %70 : vector<2x8xf32> to vector<2x8x1xf32>
      %cst_50 = arith.constant 5.120000e+02 : f32
      %72 = vector.broadcast %cst_50 : f32 to vector<2x8x1xf32>
      %73 = arith.divf %71, %72 : vector<2x8x1xf32>
      %74 = vector.broadcast %66 : vector<2x8x1xf32> to vector<2x8x512xf32>
      %75 = arith.subf %62, %74 : vector<2x8x512xf32>
      %cst_51 = arith.constant 9.99999974E-6 : f32
      %76 = vector.broadcast %cst_51 : f32 to vector<2x8x1xf32>
      %77 = arith.addf %73, %76 : vector<2x8x1xf32>
      %78 = math.rsqrt %77 : vector<2x8x1xf32>
      %79 = vector.broadcast %78 : vector<2x8x1xf32> to vector<2x8x512xf32>
      %80 = arith.mulf %75, %79 : vector<2x8x512xf32>
      %c0_52 = arith.constant 0 : index
      %c0_53 = arith.constant 0 : index
      %c0_54 = arith.constant 0 : index
      %81 = vector.load %arg11[%c0_52, %c0_53, %c0_54] : memref<2x8x512xf32, #tpu.memory_space<vmem>>, vector<2x8x512xf32>
      tpu.vector_store %arg11[%c0_52, %c0_53, %c0_54], %80 {strides = array<i32>} : memref<2x8x512xf32, #tpu.memory_space<vmem>>, vector<2x8x512xf32>,
    } else {
    }
    return
  }
  func.func @transform_0(%arg0: i32, %arg1: i32) -> (i32, i32, i32) {
    %c0_i32 = arith.constant 0 : i32
    %c0_i32_0 = arith.constant 0 : i32
    %c0_i32_1 = arith.constant 0 : i32
    return %arg0, %c0_i32, %c0_i32_0 : i32, i32, i32
  }
  func.func @transform_1(%arg0: i32, %arg1: i32) -> (i32, i32, i32) {
    %c0_i32 = arith.constant 0 : i32
    %c0_i32_0 = arith.constant 0 : i32
    %c0_i32_1 = arith.constant 0 : i32
    return %arg0, %c0_i32, %c0_i32_0 : i32, i32, i32
  }
  func.func @transform_2(%arg0: i32, %arg1: i32) -> (i32, i32, i32) {
    %c0_i32 = arith.constant 0 : i32
    %c0_i32_0 = arith.constant 0 : i32
    %c0_i32_1 = arith.constant 0 : i32
    return %arg0, %c0_i32, %c0_i32_0 : i32, i32, i32
  }
  func.func @transform_3(%arg0: i32, %arg1: i32) -> (i32, i32, i32) {
    %c0_i32 = arith.constant 0 : i32
    %c0_i32_0 = arith.constant 0 : i32
    %c0_i32_1 = arith.constant 0 : i32
    return %arg0, %c0_i32, %c0_i32_0 : i32, i32, i32
  }
  func.func @transform_4(%arg0: i32, %arg1: i32) -> (i32, i32, i32, i32) {
    %c0_i32 = arith.constant 0 : i32
    %c0_i32_0 = arith.constant 0 : i32
    %c0_i32_1 = arith.constant 0 : i32
    return %arg0, %arg1, %c0_i32, %c0_i32_0 : i32, i32, i32, i32
  }
  func.func @transform_5(%arg0: i32, %arg1: i32) -> (i32, i32, i32) {
    %c0_i32 = arith.constant 0 : i32
    %c0_i32_0 = arith.constant 0 : i32
    %c0_i32_1 = arith.constant 0 : i32
    return %arg1, %c0_i32, %c0_i32_0 : i32, i32, i32
  }
  func.func @transform_6(%arg0: i32, %arg1: i32) -> (i32, i32, i32) {
    %c0_i32 = arith.constant 0 : i32
    %c0_i32_0 = arith.constant 0 : i32
    %c0_i32_1 = arith.constant 0 : i32
    return %arg1, %c0_i32, %c0_i32_0 : i32, i32, i32
  }
  func.func @transform_7(%arg0: i32, %arg1: i32) -> (i32, i32, i32) {
    %c0_i32 = arith.constant 0 : i32
    %c0_i32_0 = arith.constant 0 : i32
    %c0_i32_1 = arith.constant 0 : i32
    return %arg1, %c0_i32, %c0_i32_0 : i32, i32, i32
  }
  func.func @transform_8(%arg0: i32, %arg1: i32) -> (i32, i32, i32) {
    %c0_i32 = arith.constant 0 : i32
    %c0_i32_0 = arith.constant 0 : i32
    %c0_i32_1 = arith.constant 0 : i32
    return %arg1, %c0_i32, %c0_i32_0 : i32, i32, i32
  }
  func.func @transform_9(%arg0: i32, %arg1: i32) -> (i32, i32, i32) {
    %c0_i32 = arith.constant 0 : i32
    %c0_i32_0 = arith.constant 0 : i32
    %c0_i32_1 = arith.constant 0 : i32
    return %arg0, %c0_i32, %c0_i32_0 : i32, i32, i32
  }
  func.func @transform_10(%arg0: i32, %arg1: i32) -> (i32, i32, i32, i32) {
    %c0_i32 = arith.constant 0 : i32
    %c0_i32_0 = arith.constant 0 : i32
    %c0_i32_1 = arith.constant 0 : i32
    return %arg0, %arg1, %c0_i32, %c0_i32_0 : i32, i32, i32, i32
  }
}

</mosaic_0001>

<bundles_post_ra>
// kernel: multi_head_attention_encoder.1
= control target key start
LH: loop header
LB: loop body
LE: loop exit
PB: predicated region body
PF: predicated region fallthrough
CT: control target
= control target key end

     0   :  { %s3517_s0 = inlined_call_operand.vmem [shape: f32[2,8,512], index: 0, kind: input, shape index: {}]   ;;  %s3518_s1 = inlined_call_operand.vmem [shape: bf16[2,8,512], index: 1, kind: input, shape index: {}]   ;;  %s3519_s2 = inlined_call_operand.vmem [shape: bf16[2,8,512], index: 2, kind: input, shape index: {}]   ;;  %s3520_s3 = inlined_call_operand.vmem [shape: s8[2,8,8], index: 3, kind: input, shape index: {}]   ;;  %s3521_s4 = inlined_call_operand.vmem [shape: bf16[2,8,8,8], index: 4, kind: input, shape index: {}]   ;;  %s3522_s5 = inlined_call_operand.vmem [shape: bf16[8,512,64], index: 5, kind: input, shape index: {}]   ;;  %s3523_s6 = inlined_call_operand.vmem [shape: bf16[8,512,64], index: 6, kind: input, shape index: {}]   ;;  %s3524_s7 = inlined_call_operand.vmem [shape: bf16[8,512,64], index: 7, kind: input, shape index: {}]   ;;  %s3525_s8 = inlined_call_operand.vmem [shape: bf16[8,64,512], index: 8, kind: input, shape index: {}]   ;;  %s3526_s9 = inlined_call_operand.hbm [shape: f32[2,8,512], index: 9, kind: output, shape index: {0}]   ;;  %s3527_s10 = inlined_call_operand.vmem [shape: bf16[2,8,8,8], index: 10, kind: output, shape index: {1}]  }
   0x1   :  { %3531 = sst [smem:[#allocation12_spill]] %s3521_s4 }
   0x2   :  { %16 = vsyncpa [#allocation5], 0  ;;  %s3172_s13 = smov 0   ;;  %s3174_s14 = smov 0  }
   0x3   :  { %s3176_s15 = smov 0   ;;  %s3178_s16 = smov 0  }
   0x4   :  { %s3180_s17 = smov 0  }
   0x5 LB: > { %3532 = sst [smem:[#allocation8_spill]] %s3096_s14  ;;  %s31_s18 = sadd.s32 1, %s3104_s16  ;;  %s3108_s17 = sphi %s3180_s17, %s22_s17   ;;  %s3104_s16 = sphi %s3178_s16, %s3542_s16   ;;  %s3100_s15 = sphi %s3176_s15, %s3541_s15   ;;  %s3096_s14 = sphi %s3174_s14, %s3540_s14   ;;  %s3092_s13 = sphi %s3172_s13, %s3539_s13  }
   0x6   : > { %3533 = sst [smem:[#allocation9_spill]] %s3104_s16  ;;  %s2504_s19 = sadd.s32 4294967295, %s3108_s17  }
   0x7   : > { %p32_p0 = scmp.ge.s32.totalorder %s31_s18, 8  ;;  %p154_p1 = scmp.ne.s32.totalorder %s3096_s14, %s3092_s13 }
   0x8   : > { %p155_p2 = scmp.eq.s32.totalorder %s3108_s17, 0  ;;  %p3204_p4 = scmp.eq.s32.totalorder %s2504_s19, 7 }
   0x9   : > { %s3544_s18 = smov (%p32_p0, %s31_s18), 0  ;;  %s147_s22 = sadd.s32 1, %s3096_s14 }
   0xa   : > { %3534 = sst [smem:[#allocation10_spill]] %s3544_s18  ;;  %p156_p3 = por %p155_p2, %p154_p1 }
   0xb   : > { %s143_s21 = ssub.s32 %s3104_s16, %s3544_s18  ;;  %p3213_p6 = por %p3204_p4, %p154_p1 }
   0xc   : > { %p145_p5 = scmp.eq.s32.totalorder %s143_s21, 0  ;;  %p2511_p7 = scmp.ge.s32.totalorder %s3108_s17, 8 }
   0xe   : > { %s3218_s24 = scalar_select %p145_p5, %s3096_s14, %s147_s22  }
   0xf   : > { %377 = sbr.rel (%p2511_p7) target bundleno = 32 (0x20), region = 32 }
  0x10   : > { %3537 = sst [smem:[#allocation11_spill]] %s3218_s24 }
  0x14   : > { %380 = sbr.rel (!%p156_p3) target bundleno = 32 (0x20), region = 36  ;;  %s382_s25 = sand.u32 (%p156_p3), 1, %s3096_s14  }
  0x15   : > { %s2513_s26 = sshll.u32 (%p156_p3), %s3104_s16, 2  ;;  %s2512_s27 = sshll.u32 (%p156_p3), %s382_s25, 3 }
  0x16   : > { %s3538_s4 = sld [smem:[#allocation12_spill]] (%p156_p3)  ;;  %s384_s11 = scalar_lea.vmem (%p156_p3), [#allocation3], %s2512_s27 }
  0x1c   : > { %s389_s30 = scalar_lea.vmem %s3538_s4, %s2513_s26 }
  0x1d   : > { %v406_v0 = vld [vmem:[%s389_s30] sm:$0xf] }
  0x1e   : > { %v408_v1 = vld [vmem:[%s389_s30 + $0x20] sm:$0xf]  ;;  %407 = vst [vmem:[%s384_s11] sm:$0xf] %v406_v0 }
  0x1f   : > { %409 = vst [vmem:[%s384_s11 + $0x4] sm:$0xf] %v408_v1 }
  0x20 PF: > { %p2514_p8 = scmp.ge.s32.totalorder %s3108_s17, 1  ;;  %p468_p9 = scmp.lt.s32.totalorder %s3108_s17, 9 }
  0x22   : > { %p469_p10 = pnand %p2514_p8, %p468_p9 }
  0x23   : > { %s475_s12 = sand.u32 (!%p469_p10), 1, %s3092_s13   ;;  %p582_p11 = scmp.lt.s32.totalorder (!%p469_p10), %s3100_s15, 7 }
  0x24   : > { %472 = sbr.rel (%p469_p10) target bundleno = 1585 (0x631), region = 93  ;;  %s3230_s19 = sshll.u32 (!%p469_p10), %s475_s12, 3 }
  0x25   : > { %s3255_s14 = scalar_lea.vmem (!%p469_p10), [#allocation6], %s3230_s19  ;;  %p2525_p12 = scmp.ne.s32.totalorder (!%p469_p10), %s3100_s15, 0 }
  0x29   : > { %s583_s21 = scalar_select %p582_p11, %s3100_s15, 7 }
  0x2a   : > { %610 = sbr.rel (%p2525_p12) target bundleno = 52 (0x34), region = 101 }
  0x2b   : > { %s2666_s22 = sshll.u32 %s583_s21, 8  ;;  %s2669_s25 = sshll.u32 %s583_s21, 7 }
  0x2c   : > { %s3236_s28 = scalar_lea.vmem %s3522_s5, %s2666_s22  ;;  %s3241_s11 = scalar_lea.vmem %s3523_s6, %s2666_s22 }
  0x2d   : > { %s3246_s12 = scalar_lea.vmem %s3524_s7, %s2666_s22  ;;  %s3251_s24 = scalar_lea.vmem %s3525_s8, %s2669_s25 }
  0x2e   : > { %s477_s21 = scalar_lea.vmem [#allocation3], %s3230_s19 }
  0x2f   : > { %v3110_v2 = vmov 0.0  }
  0x30   : > { %611 = vst [vmem:[#allocation2 + $0x30] sm:$0xff] %v3110_v2  ;;  %612 = vst [vmem:[#allocation2] sm:$0xff] %v3110_v2 }
  0x31   : > { %613 = vst [vmem:[#allocation2 + $0x18] sm:$0xff] %v3110_v2  ;;  %614 = vst [vmem:[#allocation2 + $0x10] sm:$0xff] %v3110_v2 }
  0x32   : > { %615 = vst [vmem:[#allocation2 + $0x8] sm:$0xff] %v3110_v2  ;;  %616 = vst [vmem:[#allocation2 + $0x20] sm:$0xff] %v3110_v2 }
  0x33   : > { %617 = vst [vmem:[#allocation2 + $0x28] sm:$0xff] %v3110_v2  ;;  %618 = vst [vmem:[#allocation2 + $0x38] sm:$0xff] %v3110_v2 }
  0x34 PF: > { %v2898_v3 = vld [vmem:[%s3236_s28 + $0x78] sm:$0xff]   ;;  %v2902_v7 = vld [vmem:[%s3236_s28 + $0x70] sm:$0xff]   ;;  %v2906_v11 = vld [vmem:[%s3236_s28 + $0x68] sm:$0xff]   ;;  %vm3112_vm0 = vmmov 0   ;;  %vm1715_vm1 = vcmask 523264   ;;  %vm1851_vm2 = vcmask 1043456  }
  0x35   : > { %v2899_v4 = vld [vmem:[%s3236_s28 + $0xf8] sm:$0xff]   ;;  %2681 = vmatprep.subr.bf16.mxu0 %v2898_v3  ;;  %v2903_v8 = vld [vmem:[%s3236_s28 + $0xf0] sm:$0xff]   ;;  %v2907_v12 = vld [vmem:[%s3236_s28 + $0xe8] sm:$0xff]   ;;  %vm1820_vm6 = vcmask 64512   ;;  %vm1845_vm8 = vcmask 60416   ;;  %p2659_p13 = scmp.ne.s32.totalorder %s3100_s15, 7 }
  0x36   : > { %v2900_v5 = vld [vmem:[%s3236_s28 + $0x38] sm:$0xff]   ;;  %2703 = vmatprep.subr.bf16.mxu1 %v2899_v4  ;;  %v2904_v9 = vld [vmem:[%s3236_s28 + $0x30] sm:$0xff]   ;;  %v2908_v13 = vld [vmem:[%s3236_s28 + $0x28] sm:$0xff]  }
  0x37   : > { %v2901_v6 = vld [vmem:[%s3236_s28 + $0xb8] sm:$0xff]   ;;  %2682 = vmatpush3.bf16.msra.mxu0 %v2900_v5  ;;  %v2905_v10 = vld [vmem:[%s3236_s28 + $0xb0] sm:$0xff]   ;;  %v2909_v14 = vld [vmem:[%s3236_s28 + $0xa8] sm:$0xff]  }
  0x38   : > { %2704 = vmatpush3.bf16.msra.mxu1 %v2901_v6  ;;  %2683 = vmatprep.subr.bf16.mxu0 %v2902_v7  ;;  %v2910_v15 = vld [vmem:[%s3236_s28 + $0x60] sm:$0xff]   ;;  %v2914_v19 = vld [vmem:[%s3236_s28 + $0x58] sm:$0xff]   ;;  %v2918_v23 = vld [vmem:[%s3236_s28 + $0x50] sm:$0xff]  }
  0x39   : > { %2705 = vmatprep.subr.bf16.mxu1 %v2903_v8  ;;  %v2911_v16 = vld [vmem:[%s3236_s28 + $0xe0] sm:$0xff]   ;;  %v2915_v20 = vld [vmem:[%s3236_s28 + $0xd8] sm:$0xff]   ;;  %v2919_v24 = vld [vmem:[%s3236_s28 + $0xd0] sm:$0xff]  }
  0x3a   : > { %v2912_v17 = vld [vmem:[%s3236_s28 + $0x20] sm:$0xff]   ;;  %v2916_v21 = vld [vmem:[%s3236_s28 + $0x18] sm:$0xff]   ;;  %v2920_v25 = vld [vmem:[%s3236_s28 + $0x10] sm:$0xff]  }
  0x3b   : > { %2684 = vmatpush3.bf16.msra.mxu0 %v2904_v9  ;;  %v2913_v18 = vld [vmem:[%s3236_s28 + $0xa0] sm:$0xff]   ;;  %v2917_v22 = vld [vmem:[%s3236_s28 + $0x98] sm:$0xff]   ;;  %v2921_v26 = vld [vmem:[%s3236_s28 + $0x90] sm:$0xff]  }
  0x3c   : > { %2706 = vmatpush3.bf16.msra.mxu1 %v2905_v10  ;;  %2685 = vmatprep.subr.bf16.mxu0 %v2906_v11  ;;  %v2922_v27 = vld [vmem:[%s3236_s28 + $0x48] sm:$0xff]   ;;  %v2926_v31 = vld [vmem:[%s3236_s28 + $0x40] sm:$0xff]   ;;  %v3303_v37 = vld [vmem:[%s3517_s0 + $0x18] sm:$0xff] }
  0x3d   : > { %2707 = vmatprep.subr.bf16.mxu1 %v2907_v12  ;;  %v2923_v28 = vld [vmem:[%s3236_s28 + $0xc8] sm:$0xff]   ;;  %v2927_v32 = vld [vmem:[%s3236_s28 + $0xc0] sm:$0xff]   ;;  %v3310_v39 = vld [vmem:[%s3517_s0 + $0x38] sm:$0xff] }
  0x3e   : > { %v2924_v29 = vld [vmem:[%s3236_s28 + $0x8] sm:$0xff]   ;;  %v2928_v33 = vld [vmem:[%s3236_s28] sm:$0xff]   ;;  %v630_v42 = vpack.c.bf16 %v3310_v39, %v3303_v37  ;;  %v3329_v44 = vld [vmem:[%s3517_s0 + $0x10] sm:$0xff] }
  0x3f   : > { %2686 = vmatpush3.bf16.msra.mxu0 %v2908_v13  ;;  %v2925_v30 = vld [vmem:[%s3236_s28 + $0x88] sm:$0xff]   ;;  %v2929_v34 = vld [vmem:[%s3236_s28 + $0x80] sm:$0xff]   ;;  %v3334_v45 = vld [vmem:[%s3517_s0 + $0x30] sm:$0xff] }
  0x40   : > { %2708 = vmatpush3.bf16.msra.mxu1 %v2909_v14  ;;  %2687 = vmatprep.subr.bf16.mxu0 %v2910_v15  ;;  %v3293_v35 = vld [vmem:[%s3517_s0 + $0x8] sm:$0xff]  ;;  %v3315_v40 = vld [vmem:[%s3517_s0] sm:$0xff]  ;;  %v629_v46 = vpack.c.bf16 %v3334_v45, %v3329_v44  ;;  %v2930_v47 = vld [vmem:[%s3241_s11 + $0x78] sm:$0xff]  }
  0x41   : > { %2709 = vmatprep.subr.bf16.mxu1 %v2911_v16  ;;  %v3298_v36 = vld [vmem:[%s3517_s0 + $0x28] sm:$0xff]  ;;  %v3320_v41 = vld [vmem:[%s3517_s0 + $0x20] sm:$0xff]  ;;  %968 = vmatprep.mubr.bf16.mxu1 %v630_v42  ;;  %v2931_v48 = vld [vmem:[%s3241_s11 + $0xf8] sm:$0xff]  }
  0x42   : > { %v628_v38 = vpack.c.bf16 %v3298_v36, %v3293_v35  ;;  %v627_v43 = vpack.c.bf16 %v3320_v41, %v3315_v40  ;;  %v2932_v49 = vld [vmem:[%s3241_s11 + $0x38] sm:$0xff]   ;;  %v2934_v51 = vld [vmem:[%s3241_s11 + $0x70] sm:$0xff]   ;;  %v2938_v55 = vld [vmem:[%s3241_s11 + $0x68] sm:$0xff]  }
  0x43   : > { %2688 = vmatpush3.bf16.msra.mxu0 %v2912_v17  ;;  %v2933_v50 = vld [vmem:[%s3241_s11 + $0xb8] sm:$0xff]   ;;  %v2935_v52 = vld [vmem:[%s3241_s11 + $0xf0] sm:$0xff]   ;;  %v2939_v56 = vld [vmem:[%s3241_s11 + $0xe8] sm:$0xff]  }
  0x44   : > { %2710 = vmatpush3.bf16.msra.mxu1 %v2913_v18  ;;  %2689 = vmatprep.subr.bf16.mxu0 %v2914_v19  ;;  %v2936_v53 = vld [vmem:[%s3241_s11 + $0x30] sm:$0xff]   ;;  %v2940_v57 = vld [vmem:[%s3241_s11 + $0x28] sm:$0xff]   ;;  %v2942_v59 = vld [vmem:[%s3241_s11 + $0x60] sm:$0xff]  }
  0x45   : > { %2711 = vmatprep.subr.bf16.mxu1 %v2915_v20  ;;  %927 = vmatprep.mubr.bf16.mxu0 %v628_v38  ;;  %v2937_v54 = vld [vmem:[%s3241_s11 + $0xb0] sm:$0xff]   ;;  %v2941_v58 = vld [vmem:[%s3241_s11 + $0xa8] sm:$0xff]   ;;  %v2943_v60 = vld [vmem:[%s3241_s11 + $0xe0] sm:$0xff]  }
  0x46   : > { %v2944_v61 = vld [vmem:[%s3241_s11 + $0x20] sm:$0xff]   ;;  %v2946_v63 = vld [vmem:[%s3241_s11 + $0x58] sm:$0xff]   ;;  %v2950_v3 = vld [vmem:[%s3241_s11 + $0x50] sm:$0xff]  }
  0x47   : > { %2690 = vmatpush3.bf16.msra.mxu0 %v2916_v21  ;;  %v2945_v62 = vld [vmem:[%s3241_s11 + $0xa0] sm:$0xff]   ;;  %v2947_v0 = vld [vmem:[%s3241_s11 + $0xd8] sm:$0xff]   ;;  %v2951_v4 = vld [vmem:[%s3241_s11 + $0xd0] sm:$0xff]  }
  0x48   : > { %2712 = vmatpush3.bf16.msra.mxu1 %v2917_v22  ;;  %2691 = vmatprep.subr.bf16.mxu0 %v2918_v23  ;;  %v2948_v1 = vld [vmem:[%s3241_s11 + $0x18] sm:$0xff]   ;;  %v2952_v5 = vld [vmem:[%s3241_s11 + $0x10] sm:$0xff]   ;;  %v2954_v7 = vld [vmem:[%s3241_s11 + $0x48] sm:$0xff]  }
  0x49   : > { %2713 = vmatprep.subr.bf16.mxu1 %v2919_v24  ;;  %v2949_v2 = vld [vmem:[%s3241_s11 + $0x98] sm:$0xff]   ;;  %v2953_v6 = vld [vmem:[%s3241_s11 + $0x90] sm:$0xff]   ;;  %v2955_v8 = vld [vmem:[%s3241_s11 + $0xc8] sm:$0xff]  }
  0x4a   : > { %v2956_v9 = vld [vmem:[%s3241_s11 + $0x8] sm:$0xff]   ;;  %v2958_v11 = vld [vmem:[%s3241_s11 + $0x40] sm:$0xff]   ;;  %v2968_v19 = vld [vmem:[%s3246_s12 + $0x78] sm:$0xff]  }
  0x4b   : > { %2692 = vmatpush3.bf16.msra.mxu0 %v2920_v25  ;;  %v2957_v10 = vld [vmem:[%s3241_s11 + $0x88] sm:$0xff]   ;;  %v2959_v12 = vld [vmem:[%s3241_s11 + $0xc0] sm:$0xff]   ;;  %v2969_v20 = vld [vmem:[%s3246_s12 + $0xf8] sm:$0xff]  }
  0x4c   : > { %2714 = vmatpush3.bf16.msra.mxu1 %v2921_v26  ;;  %2693 = vmatprep.subr.bf16.mxu0 %v2922_v27  ;;  %v2960_v13 = vld [vmem:[%s3241_s11] sm:$0xff]   ;;  %v2965_v17 = vld [vmem:[%s3518_s1 + $0x8] ss:$16 sps:$4 sm:$0xff]   ;;  %v2967_v18 = vld [vmem:[%s3518_s1 + $0xc] ss:$16 sps:$4 sm:$0xff]  }
  0x4d   : > { %2715 = vmatprep.subr.bf16.mxu1 %v2923_v28  ;;  %v2961_v14 = vld [vmem:[%s3241_s11 + $0x80] sm:$0xff]   ;;  %v2970_v21 = vld [vmem:[%s3246_s12 + $0x38] sm:$0xff]   ;;  %v2972_v23 = vld [vmem:[%s3246_s12 + $0x70] sm:$0xff]  }
  0x4e   : > { %v2962_v15 = vld [vmem:[%s3518_s1] ss:$16 sps:$4 sm:$0xff]   ;;  %v2964_v16 = vld [vmem:[%s3518_s1 + $0x4] ss:$16 sps:$4 sm:$0xff]   ;;  %v2971_v22 = vld [vmem:[%s3246_s12 + $0xb8] sm:$0xff]  }
  0x4f   : > { %2694 = vmatpush3.bf16.msra.mxu0 %v2924_v29  ;;  %v2973_v24 = vld [vmem:[%s3246_s12 + $0xf0] sm:$0xff]   ;;  %v2976_v27 = vld [vmem:[%s3246_s12 + $0x68] sm:$0xff]   ;;  %v2984_v38 = vld [vmem:[%s3246_s12 + $0x58] sm:$0xff]  }
  0x50   : > { %2716 = vmatpush3.bf16.msra.mxu1 %v2925_v30  ;;  %2695 = vmatprep.subr.bf16.mxu0 %v2926_v31  ;;  %v2974_v25 = vld [vmem:[%s3246_s12 + $0x30] sm:$0xff]   ;;  %v2977_v28 = vld [vmem:[%s3246_s12 + $0xe8] sm:$0xff]   ;;  %v2980_v31 = vld [vmem:[%s3246_s12 + $0x60] sm:$0xff]  }
  0x51   : > { %2717 = vmatprep.subr.bf16.mxu1 %v2927_v32  ;;  %v2975_v26 = vld [vmem:[%s3246_s12 + $0xb0] sm:$0xff]   ;;  %v2978_v29 = vld [vmem:[%s3246_s12 + $0x28] sm:$0xff]   ;;  %v2981_v32 = vld [vmem:[%s3246_s12 + $0xe0] sm:$0xff]  }
  0x52   : > { %v2979_v30 = vld [vmem:[%s3246_s12 + $0xa8] sm:$0xff]   ;;  %v2985_v42 = vld [vmem:[%s3246_s12 + $0xd8] sm:$0xff]  }
  0x53   : > { %2696 = vmatpush3.bf16.msra.mxu0 %v2928_v33  ;;  %v2982_v33 = vld [vmem:[%s3246_s12 + $0x20] sm:$0xff]  }
  0x54   : > { %2718 = vmatpush3.bf16.msra.mxu1 %v2929_v34  ;;  %2725 = vmatprep.subr.bf16.mxu0 %v2930_v47  ;;  %v2983_v34 = vld [vmem:[%s3246_s12 + $0xa0] sm:$0xff]   ;;  %v2988_v47 = vld [vmem:[%s3246_s12 + $0x50] sm:$0xff]  }
  0x55   : > { %2747 = vmatprep.subr.bf16.mxu1 %v2931_v48  ;;  %v2989_v48 = vld [vmem:[%s3246_s12 + $0xd0] sm:$0xff]  }
  0x56   : > { %928 = vmatmul.mubr.bf16.vlgmr.msra.gmra.mxu0 %v627_v43  ;;  %v2986_v43 = vld [vmem:[%s3246_s12 + $0x18] sm:$0xff]  }
  0x57   : > { %969 = vmatmul.mubr.bf16.vlgmr.msra.gmra.mxu1 %v629_v46  ;;  %2726 = vmatpush3.bf16.msra.mxu0 %v2932_v49  ;;  %v2987_v46 = vld [vmem:[%s3246_s12 + $0x98] sm:$0xff]   ;;  %v2990_v49 = vld [vmem:[%s3246_s12 + $0x10] sm:$0xff]  }
  0x58   : > { %2748 = vmatpush3.bf16.msra.mxu1 %v2933_v50  ;;  %2727 = vmatprep.subr.bf16.mxu0 %v2934_v51  ;;  %v2991_v50 = vld [vmem:[%s3246_s12 + $0x90] sm:$0xff]   ;;  %v2992_v51 = vld [vmem:[%s3246_s12 + $0x48] sm:$0xff]  }
  0x59   : > { %2749 = vmatprep.subr.bf16.mxu1 %v2935_v52  ;;  %1285 = vmatprep.mubr.bf16.mxu0 %v2964_v16  ;;  %v2993_v52 = vld [vmem:[%s3246_s12 + $0xc8] sm:$0xff]  }
  0x5a   : > { %1326 = vmatprep.mubr.bf16.mxu1 %v2967_v18 }
  0x5b   : > { %2728 = vmatpush3.bf16.msra.mxu0 %v2936_v53  ;;  %v2994_v53 = vld [vmem:[%s3246_s12 + $0x8] sm:$0xff]  }
  0x5c   : > { %2750 = vmatpush3.bf16.msra.mxu1 %v2937_v54  ;;  %2729 = vmatprep.subr.bf16.mxu0 %v2938_v55  ;;  %v2995_v54 = vld [vmem:[%s3246_s12 + $0x88] sm:$0xff]   ;;  %v2996_v55 = vld [vmem:[%s3246_s12 + $0x40] sm:$0xff]  }
  0x5d   : > { %2751 = vmatprep.subr.bf16.mxu1 %v2939_v56  ;;  %v2997_v56 = vld [vmem:[%s3246_s12 + $0xc0] sm:$0xff]  }
  0x5f   : > { %2730 = vmatpush3.bf16.msra.mxu0 %v2940_v57  ;;  %v2998_v57 = vld [vmem:[%s3246_s12] sm:$0xff]  }
  0x60   : > { %2752 = vmatpush3.bf16.msra.mxu1 %v2941_v58  ;;  %2731 = vmatprep.subr.bf16.mxu0 %v2942_v59  ;;  %v2999_v58 = vld [vmem:[%s3246_s12 + $0x80] sm:$0xff]  }
  0x61   : > { %2753 = vmatprep.subr.bf16.mxu1 %v2943_v60  ;;  %v3002_v59 = vld [vmem:[%s3519_s2 + $0x4] ss:$16 sps:$4 sm:$0xff]   ;;  %v3005_v60 = vld [vmem:[%s3519_s2 + $0xc] ss:$16 sps:$4 sm:$0xff]  }
  0x63   : > { %2732 = vmatpush3.bf16.msra.mxu0 %v2944_v61  ;;  %v3000_v61 = vld [vmem:[%s3519_s2] ss:$16 sps:$4 sm:$0xff]  }
  0x64   : > { %2754 = vmatpush3.bf16.msra.mxu1 %v2945_v62  ;;  %2733 = vmatprep.subr.bf16.mxu0 %v2946_v63  ;;  %v3003_v62 = vld [vmem:[%s3519_s2 + $0x8] ss:$16 sps:$4 sm:$0xff]   ;;  %v3111_v63 = vmov 0.0  }
  0x65   : > { %2755 = vmatprep.subr.bf16.mxu1 %v2947_v0 }
  0x67   : > { %2734 = vmatpush3.bf16.msra.mxu0 %v2948_v1 }
  0x68   : > { %2756 = vmatpush3.bf16.msra.mxu1 %v2949_v2  ;;  %2735 = vmatprep.subr.bf16.mxu0 %v2950_v3 }
  0x69   : > { %2757 = vmatprep.subr.bf16.mxu1 %v2951_v4 }
  0x6b   : > { %2736 = vmatpush3.bf16.msra.mxu0 %v2952_v5 }
  0x6c   : > { %2758 = vmatpush3.bf16.msra.mxu1 %v2953_v6  ;;  %2737 = vmatprep.subr.bf16.mxu0 %v2954_v7 }
  0x6d   : > { %2759 = vmatprep.subr.bf16.mxu1 %v2955_v8 }
  0x6f   : > { %2738 = vmatpush3.bf16.msra.mxu0 %v2956_v9 }
  0x70   : > { %2760 = vmatpush3.bf16.msra.mxu1 %v2957_v10  ;;  %2739 = vmatprep.subr.bf16.mxu0 %v2958_v11 }
  0x71   : > { %2761 = vmatprep.subr.bf16.mxu1 %v2959_v12 }
  0x73   : > { %2740 = vmatpush3.bf16.msra.mxu0 %v2960_v13 }
  0x74   : > { %2762 = vmatpush3.bf16.msra.mxu1 %v2961_v14  ;;  %2769 = vmatprep.subr.bf16.mxu0 %v2968_v19 }
  0x75   : > { %2791 = vmatprep.subr.bf16.mxu1 %v2969_v20 }
  0x76   : > { %1286 = vmatmul.mubr.bf16.vlgmr.msra.gmra.mxu0 %v2962_v15 }
  0x77   : > { %1327 = vmatmul.mubr.bf16.vlgmr.msra.gmra.mxu1 %v2965_v17  ;;  %2770 = vmatpush3.bf16.msra.mxu0 %v2970_v21 }
  0x78   : > { %2792 = vmatpush3.bf16.msra.mxu1 %v2971_v22  ;;  %2771 = vmatprep.subr.bf16.mxu0 %v2972_v23 }
  0x79   : > { %2793 = vmatprep.subr.bf16.mxu1 %v2973_v24  ;;  %1643 = vmatprep.mubr.bf16.mxu0 %v3002_v59 }
  0x7a   : > { %1684 = vmatprep.mubr.bf16.mxu1 %v3005_v60  ;;  %v1808_v60 = vld [vmem:[%s3520_s3] sm:$0x3] }
  0x7b   : > { %2772 = vmatpush3.bf16.msra.mxu0 %v2974_v25  ;;  %vm1810_vm3 = vnez %v1808_v60  ;;  %v3024_v60 = vld [vmem:[%s3251_s24] ss:$16 sps:$4 sm:$0xff]  }
  0x7c   : > { %2794 = vmatpush3.bf16.msra.mxu1 %v2975_v26  ;;  %2773 = vmatprep.subr.bf16.mxu0 %v2976_v27 }
  0x7d   : > { %2795 = vmatprep.subr.bf16.mxu1 %v2977_v28 }
  0x7f   : > { %2774 = vmatpush3.bf16.msra.mxu0 %v2978_v29 }
  0x80   : > { %2796 = vmatpush3.bf16.msra.mxu1 %v2979_v30  ;;  %2775 = vmatprep.subr.bf16.mxu0 %v2980_v31 }
  0x81   : > { %2797 = vmatprep.subr.bf16.mxu1 %v2981_v32 }
  0x83   : > { %2776 = vmatpush3.bf16.msra.mxu0 %v2982_v33 }
  0x84   : > { %2798 = vmatpush3.bf16.msra.mxu1 %v2983_v34  ;;  %2777 = vmatprep.subr.bf16.mxu0 %v2984_v38 }
  0x85   : > { %2799 = vmatprep.subr.bf16.mxu1 %v2985_v42 }
  0x87   : > { %2778 = vmatpush3.bf16.msra.mxu0 %v2986_v43 }
  0x88   : > { %2800 = vmatpush3.bf16.msra.mxu1 %v2987_v46  ;;  %2779 = vmatprep.subr.bf16.mxu0 %v2988_v47 }
  0x89   : > { %2801 = vmatprep.subr.bf16.mxu1 %v2989_v48 }
  0x8b   : > { %2780 = vmatpush3.bf16.msra.mxu0 %v2990_v49 }
  0x8c   : > { %2802 = vmatpush3.bf16.msra.mxu1 %v2991_v50  ;;  %2781 = vmatprep.subr.bf16.mxu0 %v2992_v51 }
  0x8d   : > { %2803 = vmatprep.subr.bf16.mxu1 %v2993_v52 }
  0x8f   : > { %2782 = vmatpush3.bf16.msra.mxu0 %v2994_v53 }
  0x90   : > { %2804 = vmatpush3.bf16.msra.mxu1 %v2995_v54  ;;  %2783 = vmatprep.subr.bf16.mxu0 %v2996_v55 }
  0x91   : > { %2805 = vmatprep.subr.bf16.mxu1 %v2997_v56 }
  0x93   : > { %2784 = vmatpush3.bf16.msra.mxu0 %v2998_v57 }
  0x94   : > { %2806 = vmatpush3.bf16.msra.mxu1 %v2999_v58  ;;  %2821 = vmatprep.subr.bf16.mxu0 %v3111_v63 }
  0x95   : > { %2827 = vmatprep.subr.bf16.mxu1 %v3111_v63 }
  0x96   : > { %1644 = vmatmul.mubr.bf16.vlgmr.msra.gmra.mxu0 %v3000_v61  ;;  %v1809_v61 = vld [vmem:[%s3520_s3 + $0x2] sm:$0x3] }
  0x97   : > { %1685 = vmatmul.mubr.bf16.vlgmr.msra.gmra.mxu1 %v3003_v62  ;;  %2823 = vmatprep.mubr.msk.bf16.mxu0 %vm3112_vm0, %v3111_v63  ;;  %v3113_v62 = vmov 0   ;;  %vm1811_vm4 = vnez %v1809_v61  ;;  %v3027_v61 = vld [vmem:[%s3251_s24 + $0x8] ss:$16 sps:$4 sm:$0xff]  }
  0x98   : > { %2829 = vmatprep.mubr.msk.bf16.mxu1 %vm3112_vm0, %v3111_v63 }
 0x116   : > { %v2697_v0 = vpop.f32.mrf.mxu0 }
 0x117   : > { %v2719_v1 = vpop.f32.mrf.mxu1 }
 0x118   : > { %v2698_v2 = vpop.f32.mrf.mxu0 }
 0x119   : > { %v2720_v3 = vpop.f32.mrf.mxu1  ;;  %v2699_v20 = vadd.f32 %v2698_v2, %v2697_v0  ;;  %v2678_v0 = vld [vmem:[%s477_s21] sm:$0xff]  }
 0x11a   : > { %v2700_v4 = vpop.f32.mrf.mxu0  ;;  %v2721_v21 = vadd.f32 %v2720_v3, %v2719_v1  ;;  %v2679_v2 = vunpack.c.l.bf16 %v2678_v0  ;;  %v1813_v3 = vsel %vm1811_vm4, 16843009, %v3113_v62 }
 0x11b   : > { %v2722_v5 = vpop.f32.mrf.mxu1 }
 0x11c   : > { %v2701_v6 = vpop.f32.mrf.mxu0  ;;  %v971_v26 = vadd.f32 %v2721_v21, %v2699_v20 }
 0x11d   : > { %v2723_v7 = vpop.f32.mrf.mxu1  ;;  %v2702_v27 = vadd.f32 %v2701_v6, %v2700_v4 }
 0x11e   : > { %v2724_v28 = vadd.f32 %v2723_v7, %v2722_v5  ;;  %v2670_v31 = vpack.c.bf16 %v971_v26, %v971_v26  ;;  %v1815_v5 = vunpack.c.0.s8 %v1813_v3  ;;  %v2680_v7 = vunpack.c.h.bf16 %v2678_v0 }
 0x120   : > { %v974_v32 = vadd.f32 %v2724_v28, %v2702_v27  ;;  %vm1817_vm7 = vcmp.ne.s32.totalorder %v1815_v5, 0 }
 0x122   : > { %v2671_v33 = vpack.c.bf16 %v974_v32, %v974_v32 }
 0x136   : > { %v2741_v8 = vpop.f32.mrf.mxu0 }
 0x137   : > { %v2763_v9 = vpop.f32.mrf.mxu1 }
 0x138   : > { %v2742_v10 = vpop.f32.mrf.mxu0 }
 0x139   : > { %v2743_v11 = vadd.f32 %v2742_v10, %v2741_v8  ;;  %v2764_v12 = vpop.f32.mrf.mxu1 }
 0x13a   : > { %v2744_v13 = vpop.f32.mrf.mxu0  ;;  %v2765_v14 = vadd.f32 %v2764_v12, %v2763_v9 }
 0x13b   : > { %v2766_v15 = vpop.f32.mrf.mxu1 }
 0x13c   : > { %v2745_v16 = vpop.f32.mrf.mxu0  ;;  %v1329_v17 = vadd.f32 %v2765_v14, %v2743_v11 }
 0x13d   : > { %v2746_v18 = vadd.f32 %v2745_v16, %v2744_v13  ;;  %v2767_v19 = vpop.f32.mrf.mxu1 }
 0x13e   : > { %v2672_v22 = vpack.c.bf16 %v1329_v17, %v1329_v17  ;;  %v2768_v23 = vadd.f32 %v2767_v19, %v2766_v15 }
 0x140   : > { %v1332_v24 = vadd.f32 %v2768_v23, %v2746_v18  ;;  %v1720_v25 = vsel %vm1715_vm1, %v2672_v22, 0 }
 0x141   : > { %2822 = vmatpush3.bf16.xpose.msra.mxu0 %v1720_v25 }
 0x142   : > { %v2673_v29 = vpack.c.bf16 %v1332_v24, %v1332_v24  ;;  %2833 = vmatprep.subr.bf16.mxu0 %v3111_v63 }
 0x144   : > { %v1766_v30 = vsel %vm1715_vm1, %v2673_v29, 0 }
 0x145   : > { %2828 = vmatpush3.bf16.xpose.msra.mxu1 %v1766_v30  ;;  %v3008_v30 = vld [vmem:[%s3251_s24 + $0x64] ss:$16 sps:$4 sm:$0xff]  }
 0x146   : > { %2839 = vmatprep.subr.bf16.mxu1 %v3111_v63 }
 0x148   : > { %2824 = vmatmul.mubr.msk.bf16.vlgmr.msra.gmra.mxu0 %vm1715_vm1, %v2670_v31  ;;  %v3011_v31 = vld [vmem:[%s3251_s24 + $0x6c] ss:$16 sps:$4 sm:$0xff]  }
 0x149   : > { %2835 = vmatprep.mubr.msk.bf16.mxu0 %vm3112_vm0, %v3111_v63 }
 0x14c   : > { %2830 = vmatmul.mubr.msk.bf16.vlgmr.msra.gmra.mxu1 %vm1715_vm1, %v2671_v33 }
 0x14d   : > { %2841 = vmatprep.mubr.msk.bf16.mxu1 %vm3112_vm0, %v3111_v63  ;;  %v1812_v63 = vsel %vm1810_vm3, 16843009, %v3113_v62 }
 0x14e   : > { %v1814_v1 = vunpack.c.0.s8 %v1812_v63 }
 0x150   : > { %vm1816_vm5 = vcmp.ne.s32.totalorder %v1814_v1, 0 }
 0x156   : > { %v2785_v34 = vpop.f32.mrf.mxu0 }
 0x157   : > { %v2807_v38 = vpop.f32.mrf.mxu1 }
 0x158   : > { %v2786_v42 = vpop.f32.mrf.mxu0 }
 0x159   : > { %v2808_v43 = vpop.f32.mrf.mxu1  ;;  %v2787_v46 = vadd.f32 %v2786_v42, %v2785_v34  ;;  %v3006_v42 = vld [vmem:[%s3251_s24 + $0x60] ss:$16 sps:$4 sm:$0xff]  }
 0x15a   : > { %v2809_v47 = vadd.f32 %v2808_v43, %v2807_v38  ;;  %v2788_v48 = vpop.f32.mrf.mxu0 }
 0x15b   : > { %v2810_v49 = vpop.f32.mrf.mxu1 }
 0x15c   : > { %v1687_v50 = vadd.f32 %v2809_v47, %v2787_v46  ;;  %v2789_v51 = vpop.f32.mrf.mxu0  ;;  %v3014_v46 = vld [vmem:[%s3251_s24 + $0x44] ss:$16 sps:$4 sm:$0xff]  }
 0x15d   : > { %v2811_v52 = vpop.f32.mrf.mxu1  ;;  %v2790_v53 = vadd.f32 %v2789_v51, %v2788_v48 }
 0x15e   : > { %v2812_v54 = vadd.f32 %v2811_v52, %v2810_v49  ;;  %v2674_v55 = vpack.c.bf16 %v1687_v50, %v1687_v50  ;;  %v3009_v49 = vld [vmem:[%s3251_s24 + $0x68] ss:$16 sps:$4 sm:$0xff]   ;;  %v3012_v50 = vld [vmem:[%s3251_s24 + $0x40] ss:$16 sps:$4 sm:$0xff]   ;;  %v3017_v52 = vld [vmem:[%s3251_s24 + $0x4c] ss:$16 sps:$4 sm:$0xff]  }
 0x160   : > { %v1690_v56 = vadd.f32 %v2812_v54, %v2790_v53  ;;  %v1853_v58 = vsel %vm1851_vm2, %v2674_v55, 0  ;;  %v3020_v53 = vld [vmem:[%s3251_s24 + $0x24] ss:$16 sps:$4 sm:$0xff]   ;;  %v3015_v54 = vld [vmem:[%s3251_s24 + $0x48] ss:$16 sps:$4 sm:$0xff]  }
 0x161   : > { %2834 = vmatpush3.bf16.msra.mxu0 %v1853_v58  ;;  %v3018_v55 = vld [vmem:[%s3251_s24 + $0x20] ss:$16 sps:$4 sm:$0xff]   ;;  %v3026_v58 = vld [vmem:[%s3251_s24 + $0x4] ss:$16 sps:$4 sm:$0xff]  }
 0x162   : > { %v2675_v57 = vpack.c.bf16 %v1690_v56, %v1690_v56  ;;  %2063 = vmatprep.subr.bf16.mxu0 %v3008_v30  ;;  %v3023_v56 = vld [vmem:[%s3251_s24 + $0x2c] ss:$16 sps:$4 sm:$0xff]  }
 0x164   : > { %v1899_v59 = vsel %vm1851_vm2, %v2675_v57, 0  ;;  %v3021_v57 = vld [vmem:[%s3251_s24 + $0x28] ss:$16 sps:$4 sm:$0xff]  }
 0x165   : > { %2840 = vmatpush3.bf16.msra.mxu1 %v1899_v59  ;;  %v3029_v59 = vld [vmem:[%s3251_s24 + $0xc] ss:$16 sps:$4 sm:$0xff]  }
 0x166   : > { %2106 = vmatprep.subr.bf16.mxu1 %v3011_v31 }
 0x208   : > { %v1756_v4 = vpop.f32.mrf.mxu0 }
 0x209   : > { %v1757_v6 = vadd.f32 %v2679_v2, %v1756_v4 }
 0x20a   : > { %v2825_v8 = vpop.f32.mrf.mxu0 }
 0x20b   : > { %v1818_v9 = vsel %vm1816_vm5, -1e+09, %v1757_v6  ;;  %v1945_v8 = vld [vmem:[#allocation2 + $0x18] sm:$0xff] }
 0x20c   : > { %v1759_v10 = vpop.f32.mrf.mxu0  ;;  %v1802_v11 = vpop.f32.mrf.mxu1  ;;  %v1821_v12 = vsel %vm1820_vm6, %v1818_v9, -inf }
 0x20d   : > { %v1803_v13 = vadd.f32 %v2680_v7, %v1802_v11  ;;  %1822 = vmax.xlane.f32.xlu0 %v1821_v12  ;;  %v1943_v7 = vld [vmem:[#allocation2 + $0x30] sm:$0xff]  ;;  %v1944_v11 = vld [vmem:[#allocation2] sm:$0xff] }
 0x20e   : > { %v2826_v14 = vpop.f32.mrf.mxu0  ;;  %v2831_v15 = vpop.f32.mrf.mxu1  ;;  %v1946_v12 = vld [vmem:[#allocation2 + $0x10] sm:$0xff] }
 0x20f   : > { %v1819_v16 = vsel %vm1817_vm7, -1e+09, %v1803_v13 }
 0x210   : > { %v1805_v17 = vpop.f32.mrf.mxu1  ;;  %v1824_v18 = vsel %vm1820_vm6, %v1819_v16, -inf }
 0x211   : > { %1825 = vmax.xlane.f32.xlu0 %v1824_v18  ;;  %v1947_v17 = vld [vmem:[#allocation2 + $0x8] sm:$0xff] }
 0x212   : > { %v2832_v19 = vpop.f32.mrf.mxu1  ;;  %v1949_v18 = vld [vmem:[#allocation2 + $0x28] sm:$0xff] }
 0x296   : > { %v1823_v20 = vpop.xlane.xlu0 %1822 }
 0x297   : > { %v1827_v21 = vsub.f32 %v1818_v9, %v1823_v20 }
 0x299   : > { %v1829_v22 = vmul.f32 1.442695, %v1827_v21 }
 0x29a   : > { %v1826_v23 = vpop.xlane.xlu0 %1825 }
 0x29b   : > { %3030 = vpow2.f32 %v1829_v22  ;;  %v1828_v24 = vsub.f32 %v1819_v16, %v1826_v23  ;;  %v1948_v23 = vld [vmem:[#allocation2 + $0x20] sm:$0xff] }
 0x29d   : > { %v1831_v25 = vmul.f32 1.442695, %v1828_v24  ;;  %v1950_v24 = vld [vmem:[#allocation2 + $0x38] sm:$0xff] }
 0x29f   : > { %3032 = vpow2.f32 %v1831_v25 }
 0x2a8   : > { %v3031_v26 = vpop.eup %3030 }
 0x2a9   : > { %v1833_v27 = vsel %vm1820_vm6, %v3031_v26, 0.0 }
 0x2aa   : > { %1834 = vadd.xlane.f32.xlu1 %v1833_v27 }
 0x2ac   : > { %v3033_v28 = vpop.eup %3032 }
 0x2ad   : > { %v1836_v29 = vsel %vm1820_vm6, %v3033_v28, 0.0 }
 0x2ae   : > { %1837 = vadd.xlane.f32.xlu1 %v1836_v29 }
 0x333   : > { %v1835_v32 = vpop.xlane.xlu1 %1834 }
 0x334   : > { %3034 = vrcp.f32 %v1835_v32 }
 0x337   : > { %v1838_v33 = vpop.xlane.xlu1 %1837 }
 0x338   : > { %3036 = vrcp.f32 %v1838_v33 }
 0x341   : > { %v3035_v34 = vpop.eup %3034 }
 0x342   : > { %v1841_v38 = vmul.f32 %v3035_v34, %v3031_v26 }
 0x344   : > { %v1843_v43 = vpack.c.bf16 %v1841_v38, %v1841_v38 }
 0x345   : > { %v3037_v47 = vpop.eup %3036 }
 0x346   : > { %1846 = vst.msk [vmem:[%s3255_s14] sm:$0xf] %vm1845_vm8, %v1843_v43  ;;  %2836 = vmatmul.mubr.msk.bf16.vlgmr.msra.gmra.mxu0 %vm1820_vm6, %v1843_v43  ;;  %v1842_v48 = vmul.f32 %v3037_v47, %v3033_v28 }
 0x347   : > { %2064 = vmatpush1.bf16.msra.mxu0 %v3006_v42  ;;  %2087 = vmatprep.mubr.bf16.mxu0 %v3113_v62 }
 0x348   : > { %v1844_v51 = vpack.c.bf16 %v1842_v48, %v1842_v48  ;;  %2065 = vmatprep.subr.bf16.mxu0 %v3014_v46 }
 0x34a   : > { %1847 = vst.msk [vmem:[%s3255_s14 + $0x4] sm:$0xf] %vm1845_vm8, %v1844_v51  ;;  %2842 = vmatmul.mubr.msk.bf16.vlgmr.msra.gmra.mxu1 %vm1820_vm6, %v1844_v51 }
 0x34b   : > { %2107 = vmatpush1.bf16.msra.mxu1 %v3009_v49  ;;  %2066 = vmatpush1.bf16.msra.mxu0 %v3012_v50 }
 0x34c   : > { %2108 = vmatprep.subr.bf16.mxu1 %v3017_v52  ;;  %2067 = vmatprep.subr.bf16.mxu0 %v3020_v53 }
 0x34d   : > { %2130 = vmatprep.mubr.bf16.mxu1 %v3113_v62 }
 0x34f   : > { %2109 = vmatpush1.bf16.msra.mxu1 %v3015_v54  ;;  %2068 = vmatpush1.bf16.msra.mxu0 %v3018_v55 }
 0x350   : > { %2110 = vmatprep.subr.bf16.mxu1 %v3023_v56  ;;  %2069 = vmatprep.subr.bf16.mxu0 %v3026_v58 }
 0x353   : > { %2111 = vmatpush1.bf16.msra.mxu1 %v3021_v57  ;;  %2070 = vmatpush1.bf16.msra.mxu0 %v3024_v60 }
 0x354   : > { %2112 = vmatprep.subr.bf16.mxu1 %v3029_v59 }
 0x357   : > { %2113 = vmatpush1.bf16.msra.mxu1 %v3027_v61 }
 0x406   : > { %v1889_v63 = vpop.f32.mrf.mxu0 }
 0x408   : > { %v2837_v0 = vpop.f32.mrf.mxu0 }
 0x40a   : > { %v1892_v1 = vpop.f32.mrf.mxu0  ;;  %v1935_v2 = vpop.f32.mrf.mxu1 }
 0x40b   : > { %v2676_v3 = vpack.c.bf16 %v1935_v2, %v1889_v63 }
 0x40c   : > { %v2838_v4 = vpop.f32.mrf.mxu0  ;;  %v2843_v62 = vpop.f32.mrf.mxu1 }
 0x40d   : > { %2657 = vmatmul.mubr.msk.bf16.vlgmr.msra.gmra.mxu0 %vm1715_vm1, %v2676_v3  ;;  %2658 = vmatmul.mubr.msk.bf16.vlgmr.msra.gmra.mxu1 %vm1715_vm1, %v2676_v3 }
 0x40e   : > { %v1938_v5 = vpop.f32.mrf.mxu1 }
 0x410   : > { %v2844_v6 = vpop.f32.mrf.mxu1 }
 0x4cd   : > { %v2089_v9 = vpop.f32.mrf.mxu0  ;;  %v2132_v10 = vpop.f32.mrf.mxu1 }
 0x4ce   : > { %v2141_v13 = vadd.f32 %v2089_v9, %v1943_v7  ;;  %v2143_v14 = vadd.f32 %v2132_v10, %v1945_v8 }
 0x4cf   : > { %v2091_v15 = vpop.f32.mrf.mxu0  ;;  %v2134_v16 = vpop.f32.mrf.mxu1 }
 0x4d0   : > { %2149 = vst [vmem:[#allocation2 + $0x30] sm:$0xff] %v2141_v13  ;;  %2151 = vst [vmem:[#allocation2 + $0x18] sm:$0xff] %v2143_v14  ;;  %v2142_v19 = vadd.f32 %v2091_v15, %v1944_v11  ;;  %v2144_v20 = vadd.f32 %v2134_v16, %v1946_v12 }
 0x4d1   : > { %v2093_v21 = vpop.f32.mrf.mxu0  ;;  %v2136_v22 = vpop.f32.mrf.mxu1 }
 0x4d2   : > { %2150 = vst [vmem:[#allocation2] sm:$0xff] %v2142_v19  ;;  %2152 = vst [vmem:[#allocation2 + $0x10] sm:$0xff] %v2144_v20  ;;  %v2145_v25 = vadd.f32 %v2093_v21, %v1947_v17  ;;  %v2147_v26 = vadd.f32 %v2136_v22, %v1949_v18  ;;  %2160 = sbr.rel (%p2659_p13) target bundleno = 1564 (0x61c), region = 105 }
 0x4d3   : > { %v2095_v27 = vpop.f32.mrf.mxu0  ;;  %v2138_v28 = vpop.f32.mrf.mxu1 }
 0x4d4   : > { %2153 = vst [vmem:[#allocation2 + $0x8] sm:$0xff] %v2145_v25  ;;  %2155 = vst [vmem:[#allocation2 + $0x28] sm:$0xff] %v2147_v26  ;;  %v2146_v29 = vadd.f32 %v2095_v27, %v1948_v23  ;;  %v2148_v30 = vadd.f32 %v2138_v28, %v1950_v24 }
 0x4d6   : > { %2154 = vst [vmem:[#allocation2 + $0x20] sm:$0xff] %v2146_v29  ;;  %2156 = vst [vmem:[#allocation2 + $0x38] sm:$0xff] %v2148_v30 }
 0x4d7   : > { %v2161_v31 = vld [vmem:[#allocation2 + $0x30] sm:$0xff]  ;;  %v2163_v33 = vld [vmem:[#allocation2 + $0x18] sm:$0xff] }
 0x4d8   : > { %v2169_v38 = vadd.f32 %v2161_v31, %v3315_v40  ;;  %v2171_v43 = vadd.f32 %v2163_v33, %v3329_v44 }
 0x4d9   : > { %v2162_v32 = vld [vmem:[#allocation2] sm:$0xff]  ;;  %v2164_v34 = vld [vmem:[#allocation2 + $0x10] sm:$0xff] }
 0x4da   : > { %v2170_v42 = vadd.f32 %v2162_v32, %v3293_v35  ;;  %v2172_v52 = vadd.f32 %v2164_v34, %v3303_v37 }
 0x4db   : > { %v2165_v46 = vld [vmem:[#allocation2 + $0x8] sm:$0xff] }
 0x4dc   : > { %v2167_v48 = vld [vmem:[#allocation2 + $0x28] sm:$0xff]  ;;  %v2173_v50 = vadd.f32 %v2165_v46, %v3320_v41  ;;  %v2177_v53 = vadd.f32 %v2170_v42, %v2169_v38 }
 0x4dd   : > { %v2166_v47 = vld [vmem:[#allocation2 + $0x20] sm:$0xff]  ;;  %v2168_v49 = vld [vmem:[#allocation2 + $0x38] sm:$0xff]  ;;  %v2175_v54 = vadd.f32 %v2167_v48, %v3334_v45 }
 0x4de   : > { %v2174_v51 = vadd.f32 %v2166_v47, %v3298_v36  ;;  %v2178_v56 = vadd.f32 %v2177_v53, %v2171_v43  ;;  %v2176_v40 = vadd.f32 %v2168_v49, %v3310_v39 }
 0x4e0   : > { %v2182_v55 = vadd.f32 %v2174_v51, %v2173_v50  ;;  %v2179_v57 = vadd.f32 %v2178_v56, %v2172_v52 }
 0x4e2   : > { %v2183_v35 = vadd.f32 %v2182_v55, %v2175_v54  ;;  %2180 = vadd.xlane.f32.xlu0 %v2179_v57 }
 0x4e4   : > { %v2184_v44 = vadd.f32 %v2183_v35, %v2176_v40 }
 0x4e6   : > { %2185 = vadd.xlane.f32.xlu0 %v2184_v44 }
 0x56b   : > { %v2181_v58 = vpop.xlane.xlu0 %2180 }
 0x56c   : > { %v2188_v59 = vmul.f32 0.001953125, %v2181_v58 }
 0x56e   : > { %v2190_v60 = vsub.f32 %v2169_v38, %v2188_v59  ;;  %v2191_v41 = vsub.f32 %v2170_v42, %v2188_v59  ;;  %v2192_v61 = vsub.f32 %v2171_v43, %v2188_v59  ;;  %v2193_v63 = vsub.f32 %v2172_v52, %v2188_v59 }
 0x56f   : > { %v2186_v36 = vpop.xlane.xlu0 %2185 }
 0x570   : > { %v2189_v37 = vmul.f32 0.001953125, %v2186_v36  ;;  %v2198_v0 = vmul.f32 %v2190_v60, %v2190_v60  ;;  %v2199_v1 = vmul.f32 %v2191_v41, %v2191_v41  ;;  %v2200_v45 = vmul.f32 %v2192_v61, %v2192_v61 }
 0x571   : > { %v2201_v62 = vmul.f32 %v2193_v63, %v2193_v63 }
 0x572   : > { %v2194_v2 = vsub.f32 %v2173_v50, %v2189_v37  ;;  %v2195_v3 = vsub.f32 %v2174_v51, %v2189_v37  ;;  %v2206_v4 = vadd.f32 %v2199_v1, %v2198_v0  ;;  %v2196_v39 = vsub.f32 %v2175_v54, %v2189_v37 }
 0x573   : > { %v2197_v6 = vsub.f32 %v2176_v40, %v2189_v37 }
 0x574   : > { %v2207_v5 = vadd.f32 %v2206_v4, %v2200_v45  ;;  %v2202_v7 = vmul.f32 %v2194_v2, %v2194_v2  ;;  %v2203_v8 = vmul.f32 %v2195_v3, %v2195_v3  ;;  %v2204_v10 = vmul.f32 %v2196_v39, %v2196_v39 }
 0x575   : > { %v2205_v12 = vmul.f32 %v2197_v6, %v2197_v6 }
 0x576   : > { %v2208_v9 = vadd.f32 %v2207_v5, %v2201_v62  ;;  %v2211_v11 = vadd.f32 %v2203_v8, %v2202_v7 }
 0x578   : > { %2209 = vadd.xlane.f32.xlu1 %v2208_v9  ;;  %v2212_v13 = vadd.f32 %v2211_v11, %v2204_v10 }
 0x57a   : > { %v2213_v14 = vadd.f32 %v2212_v13, %v2205_v12 }
 0x57c   : > { %2214 = vadd.xlane.f32.xlu1 %v2213_v14 }
 0x601   : > { %v2210_v15 = vpop.xlane.xlu1 %2209 }
 0x602   : > { %v2216_v16 = vmul.f32 0.001953125, %v2210_v15 }
 0x604   : > { %v2218_v17 = vadd.f32 1e-05, %v2216_v16 }
 0x605   : > { %v2215_v18 = vpop.xlane.xlu1 %2214 }
 0x606   : > { %3038 = vrsqrt.f32 %v2218_v17  ;;  %v2217_v19 = vmul.f32 0.001953125, %v2215_v18 }
 0x608   : > { %v2219_v20 = vadd.f32 1e-05, %v2217_v19 }
 0x60a   : > { %3040 = vrsqrt.f32 %v2219_v20 }
 0x613   : > { %v3039_v21 = vpop.eup %3038 }
 0x614   : > { %v2222_v22 = vmul.f32 %v3039_v21, %v2190_v60  ;;  %v2223_v23 = vmul.f32 %v3039_v21, %v2191_v41  ;;  %v2224_v24 = vmul.f32 %v3039_v21, %v2192_v61  ;;  %v2225_v25 = vmul.f32 %v3039_v21, %v2193_v63 }
 0x616   : > { %2230 = vst [vmem:[#allocation4] sm:$0xff] %v2222_v22  ;;  %2231 = vst [vmem:[#allocation4 + $0x8] sm:$0xff] %v2223_v23 }
 0x617   : > { %2232 = vst [vmem:[#allocation4 + $0x10] sm:$0xff] %v2224_v24  ;;  %2233 = vst [vmem:[#allocation4 + $0x18] sm:$0xff] %v2225_v25  ;;  %v3041_v26 = vpop.eup %3040 }
 0x618   : > { %v2226_v27 = vmul.f32 %v3041_v26, %v2194_v2  ;;  %v2227_v28 = vmul.f32 %v3041_v26, %v2195_v3  ;;  %v2228_v29 = vmul.f32 %v3041_v26, %v2196_v39  ;;  %v2229_v30 = vmul.f32 %v3041_v26, %v2197_v6 }
 0x61a   : > { %2234 = vst [vmem:[#allocation4 + $0x20] sm:$0xff] %v2226_v27  ;;  %2235 = vst [vmem:[#allocation4 + $0x28] sm:$0xff] %v2227_v28 }
 0x61b   : > { %2236 = vst [vmem:[#allocation4 + $0x30] sm:$0xff] %v2228_v29  ;;  %2237 = vst [vmem:[#allocation4 + $0x38] sm:$0xff] %v2229_v30 }
 0x61c PF: > { %s3114_s24 = smov [#allocation4]  }
 0x61d   : > { %s2252_s19 = sshll.u32 %s3114_s24, 4  ;;  %s2253_s19 = int_to_ptr.vmem [resolvable:$true] %s2252_s19 }
 0x61e   : > { %s3042_s21 = scalar_lea.vmem %s2253_s19, 1024  ;;  %p3049_p3 = scmp.lt.s32.totalorder %s2253_s19, %s2253_s19 }
 0x61f   : > { %p3043_p0 = scmp.ne.s32.totalorder %s2253_s19, %s3042_s21  ;;  %p3050_p5 = scmp.lt.s32.totalorder %s3042_s21, %s3042_s21 }
 0x621   : > { %p3044_p1 = pnand %p3043_p0, %p3204_p4  ;;  %p3051_p7 = por %p3050_p5, %p3049_p3 }
 0x623   : > { %p3045_p2 = pneg %p3044_p1 }
 0x625   : > { %p3052_p8 = pnand %p3051_p7, %p3045_p2 }
 0x627   : > { %3055 = shalt.err (!%p3052_p8)
}
 0x628   : > { %s3115_s11 = smov 512   ;;  %s3116_s16 = smov 32   ;;  %v2283_v31 = vld [vmem:[%s3255_s14] sm:$0xf] (%p3213_p6)  ;;  %v2285_v32 = vld [vmem:[%s3255_s14 + $0x4] sm:$0xf] (%p3213_p6) }
 0x629   : > { %2846 = dma.vmem_to_hbm [thread:$0]  (%p3204_p4), %s2253_s19, 1024, %s3526_s9, [#allocation5], %s3115_s11, %s3115_s11, %s3116_s16  }
 0x62a   : > { %2261 = sbr.rel (!%p3213_p6) target bundleno = 1583 (0x62f), region = 113  ;;  %s2662_s25 = sshll.u32 (%p3213_p6), %s3100_s15, 2 }
 0x62b   : > { %s2266_s28 = scalar_lea.vmem (%p3213_p6), %s3527_s10, %s2662_s25 }
 0x62c   : > { %2284 = vst [vmem:[%s2266_s28] sm:$0xf] (%p3213_p6), %v2283_v31  ;;  %2286 = vst [vmem:[%s2266_s28 + $0x20] sm:$0xf] (%p3213_p6), %v2285_v32 }
 0x62f PF: > { %3087 = dma.done.wait (%p3204_p4), [#allocation5], 1024  }
 0x630   : > { %3089 = vsyncadd (%p3204_p4), [#allocation5], 4294966272 }
 0x631 PF: > { %s22_s17 = sadd.s32 1, %s3108_s17   ;;  %s3539_s13 = sld [smem:[#allocation8_spill]] }
 0x632   : > { %p19_p6 = scmp.ge.s32.totalorder %s22_s17, 10   ;;  %s3540_s14 = sld [smem:[#allocation11_spill]] }
 0x633   : > { %s3541_s15 = sld [smem:[#allocation9_spill]] }
 0x634   : > { %s3542_s16 = sld [smem:[#allocation10_spill]]  ;;  %21 = sbr.rel (!%p19_p6) target bundleno = 5 (0x5), region = 215 }
 0x639   :  { %2328 = vsyncpa [#allocation5], 1 }
 0x63a   :  { %2330 = vsyncpa [#allocation5 + $0x1], 1 }

</bundles_post_ra>
